<compile_context>
chip_gen: v6e
topology: v6e:2x2x1
jax: 0.10.0
libtpu: 0.0.40
codegen_flags: <defaults>
</compile_context>

<pallas_src>
import functools

import jax
import jax.numpy as jnp
from jax.experimental import pallas as pl
from jax.experimental.pallas import tpu as pltpu


def _round_up(x, m):
    return (x + m - 1) // m * m


def _fused_mlp_kernel(x_ref, w_ref, b_ref, o_ref, *, num_layers):
    """x_ref: (tb, D), w_ref: (L, D, D), b_ref: (L, 1, D), o_ref: (tb, D).

    Computes Linear -> (ReLU -> Linear)* entirely in VMEM; ReLU after every
    layer except the last (matches build_fc_layers).
    """
    act = x_ref[...].astype(jnp.float32)
    for l in range(num_layers):
        # Bias folded into the accumulator, matmul-accumulate on the MXU.
        acc = b_ref[l] + jnp.dot(
            act.astype(w_ref.dtype), w_ref[l],
            preferred_element_type=jnp.float32)
        if l < num_layers - 1:
            acc = jnp.maximum(acc, 0.0)
        act = acc
    o_ref[...] = act.astype(o_ref.dtype)


def fc_forward_pallas(params, x, *, compute_dtype=jnp.float32,
                      block_batch=128):
    """params: list of (W (in, out), b (out,)); x: (B, input_size)."""
    B, f_in = x.shape
    num_layers = len(params)
    dims = [f_in] + [int(w.shape[1]) for w, _ in params]

    # Uniform lane-dense width for all layers (all real dims <= D, D % 128 == 0).
    D = _round_up(max(dims), 128)
    tb = min(block_batch, _round_up(B, 8))   # batch tile, multiple of 8
    b_pad = _round_up(B, tb)

    # Zero-pad input and pack zero-padded weights/biases into uniform slabs.
    # Zero pad-columns + zero pad-bias keep the padded lanes exactly 0 through
    # ReLU, so padding is numerically transparent.
    x_pad = jnp.zeros((b_pad, D), x.dtype).at[:B, :f_in].set(x)
    w_stack = jnp.zeros((num_layers, D, D), compute_dtype)
    b_stack = jnp.zeros((num_layers, 1, D), jnp.float32)
    for l, (w, b) in enumerate(params):
        w_stack = w_stack.at[l, :w.shape[0], :w.shape[1]].set(
            w.astype(compute_dtype))
        b_stack = b_stack.at[l, 0, :b.shape[0]].set(b.astype(jnp.float32))

    kernel = functools.partial(_fused_mlp_kernel, num_layers=num_layers)

    itemsize = jnp.dtype(x.dtype).itemsize
    w_itemsize = jnp.dtype(compute_dtype).itemsize
    # Per-grid-step VMEM footprint (double-buffered x/out, resident W/b) + slack.
    vmem_bytes = int(
        2 * tb * D * itemsize            # x tile, double buffered
        + 2 * tb * D * itemsize          # out tile, double buffered
        + num_layers * D * D * w_itemsize
        + num_layers * D * 4
        + tb * D * 4                     # f32 activation live value
        + (4 << 20))                     # headroom
    flops = 2 * b_pad * D * D * num_layers
    bytes_accessed = int(
        b_pad * D * itemsize * 2
        + num_layers * D * D * w_itemsize
        + num_layers * D * 4)

    out_pad = pl.pallas_call(
        kernel,
        out_shape=jax.ShapeDtypeStruct((b_pad, D), x.dtype),
        grid_spec=pltpu.PrefetchScalarGridSpec(
            num_scalar_prefetch=0,
            grid=(b_pad // tb,),
            in_specs=[
                pl.BlockSpec((tb, D), lambda i: (i, 0)),
                pl.BlockSpec((num_layers, D, D), lambda i: (0, 0, 0)),
                pl.BlockSpec((num_layers, 1, D), lambda i: (0, 0, 0)),
            ],
            out_specs=pl.BlockSpec((tb, D), lambda i: (i, 0)),
        ),
        compiler_params=pltpu.CompilerParams(
            dimension_semantics=("parallel",),   # batch tiles shard across TCs
            vmem_limit_bytes=vmem_bytes,
        ),
        cost_estimate=pl.CostEstimate(
            flops=flops, transcendentals=0, bytes_accessed=bytes_accessed),
    )(x_pad, w_stack, b_stack)

    # Slice the real batch rows and real last-layer width once, in plain JAX.
    return out_pad[:B, :dims[-1]]


def init_fc_params(key, input_size, hidden_size, dtype=jnp.float32):
    """Deterministic params matching build_fc_layers(input_size, hidden_size).

    Weights stored as (in, out) == PyTorch nn.Linear weight transposed.
    """
    dims = [input_size] + list(hidden_size)
    params = []
    for i in range(len(dims) - 1):
        key, kw, kb = jax.random.split(key, 3)
        bound = 1.0 / float(dims[i]) ** 0.5
        w = jax.random.uniform(kw, (dims[i], dims[i + 1]), dtype,
                               minval=-bound, maxval=bound)
        b = jax.random.uniform(kb, (dims[i + 1],), dtype,
                               minval=-bound, maxval=bound)
        params.append((w, b))
    return params


if __name__ == "__main__":
    key = jax.random.PRNGKey(0)
    batch = 8
    input_size = 32
    hidden_size = [64, 32, 16]

    kx, kp = jax.random.split(key)
    x = jax.random.normal(kx, (batch, input_size), jnp.float32)
    params = init_fc_params(kp, input_size, hidden_size)

    out = fc_forward_pallas(params, x)  # f32 compute for exact reference match
    out = jax.block_until_ready(out)

    # Pure-JAX reference (same math, no Pallas).
    ref = x
    for i, (w, b) in enumerate(params):
        ref = ref @ w + b
        if i < len(params) - 1:
            ref = jnp.maximum(ref, 0.0)

    assert out.shape == (batch, hidden_size[-1]), out.shape
    assert jnp.allclose(out, ref, atol=1e-5, rtol=1e-5), \
        float(jnp.max(jnp.abs(out - ref)))

    print("KERNEL_OK")
</pallas_src>

<mosaic_0001>
module attributes {stable_mosaic.version = 11 : i64} {
  func.func @_fused_mlp_kernel(%arg0: i32, %arg1: memref<8x128xf32, #tpu.memory_space<vmem>>, %arg2: memref<3x128x128xf32, #tpu.memory_space<vmem>>, %arg3: memref<3x1x128xf32, #tpu.memory_space<vmem>>, %arg4: memref<8x128xf32, #tpu.memory_space<vmem>>) attributes {dimension_semantics = [#tpu.dimension_semantics<parallel>], iteration_bounds = array<i64: 1>, scalar_prefetch = 0 : i64, scratch_operands = 0 : i64, tpu.core_type = #tpu.core_type<tc>, window_params = [{transform_indices = @transform_0, window_bounds = array<i64: 8, 128>}, {pipeline_mode = #tpu.pipeline_mode<synchronous>, transform_indices = @transform_1, window_bounds = array<i64: 3, 128, 128>}, {pipeline_mode = #tpu.pipeline_mode<synchronous>, transform_indices = @transform_2, window_bounds = array<i64: 3, 1, 128>}, {transform_indices = @transform_3, window_bounds = array<i64: 8, 128>}]} {
    %c0 = arith.constant 0 : index
    %c0_0 = arith.constant 0 : index
    %0 = vector.load %arg1[%c0, %c0_0] : memref<8x128xf32, #tpu.memory_space<vmem>>, vector<8x128xf32>
    %c0_1 = arith.constant 0 : index
    %c0_2 = arith.constant 0 : index
    %c0_3 = arith.constant 0 : index
    %1 = vector.load %arg3[%c0_1, %c0_2, %c0_3] : memref<3x1x128xf32, #tpu.memory_space<vmem>>, vector<1x1x128xf32>
    %2 = vector.shape_cast %1 : vector<1x1x128xf32> to vector<1x128xf32>
    %c0_4 = arith.constant 0 : index
    %c0_5 = arith.constant 0 : index
    %c0_6 = arith.constant 0 : index
    %3 = vector.load %arg2[%c0_4, %c0_5, %c0_6] : memref<3x128x128xf32, #tpu.memory_space<vmem>>, vector<1x128x128xf32>
    %4 = vector.shape_cast %3 : vector<1x128x128xf32> to vector<128x128xf32>
    %cst = arith.constant dense<0.000000e+00> : vector<8x128xf32>
    %5 = tpu.matmul %0, %4, %cst {dimension_numbers = #tpu.dot_dimension_numbers<[1], [0], [0], [1], [0, 0, 1, 1], [], []>} : vector<8x128xf32>, vector<128x128xf32>, vector<8x128xf32> -> vector<8x128xf32>
    %6 = vector.broadcast %2 : vector<1x128xf32> to vector<8x128xf32>
    %7 = arith.addf %6, %5 : vector<8x128xf32>
    %cst_7 = arith.constant 0.000000e+00 : f32
    %8 = vector.broadcast %cst_7 : f32 to vector<8x128xf32>
    %9 = arith.maximumf %7, %8 : vector<8x128xf32>
    %c1 = arith.constant 1 : index
    %c0_8 = arith.constant 0 : index
    %c0_9 = arith.constant 0 : index
    %10 = vector.load %arg3[%c1, %c0_8, %c0_9] : memref<3x1x128xf32, #tpu.memory_space<vmem>>, vector<1x1x128xf32>
    %11 = vector.shape_cast %10 : vector<1x1x128xf32> to vector<1x128xf32>
    %c1_10 = arith.constant 1 : index
    %c0_11 = arith.constant 0 : index
    %c0_12 = arith.constant 0 : index
    %12 = vector.load %arg2[%c1_10, %c0_11, %c0_12] : memref<3x128x128xf32, #tpu.memory_space<vmem>>, vector<1x128x128xf32>
    %13 = vector.shape_cast %12 : vector<1x128x128xf32> to vector<128x128xf32>
    %cst_13 = arith.constant dense<0.000000e+00> : vector<8x128xf32>
    %14 = tpu.matmul %9, %13, %cst_13 {dimension_numbers = #tpu.dot_dimension_numbers<[1], [0], [0], [1], [0, 0, 1, 1], [], []>} : vector<8x128xf32>, vector<128x128xf32>, vector<8x128xf32> -> vector<8x128xf32>
    %15 = vector.broadcast %11 : vector<1x128xf32> to vector<8x128xf32>
    %16 = arith.addf %15, %14 : vector<8x128xf32>
    %cst_14 = arith.constant 0.000000e+00 : f32
    %17 = vector.broadcast %cst_14 : f32 to vector<8x128xf32>
    %18 = arith.maximumf %16, %17 : vector<8x128xf32>
    %c2 = arith.constant 2 : index
    %c0_15 = arith.constant 0 : index
    %c0_16 = arith.constant 0 : index
    %19 = vector.load %arg3[%c2, %c0_15, %c0_16] : memref<3x1x128xf32, #tpu.memory_space<vmem>>, vector<1x1x128xf32>
    %20 = vector.shape_cast %19 : vector<1x1x128xf32> to vector<1x128xf32>
    %c2_17 = arith.constant 2 : index
    %c0_18 = arith.constant 0 : index
    %c0_19 = arith.constant 0 : index
    %21 = vector.load %arg2[%c2_17, %c0_18, %c0_19] : memref<3x128x128xf32, #tpu.memory_space<vmem>>, vector<1x128x128xf32>
    %22 = vector.shape_cast %21 : vector<1x128x128xf32> to vector<128x128xf32>
    %cst_20 = arith.constant dense<0.000000e+00> : vector<8x128xf32>
    %23 = tpu.matmul %18, %22, %cst_20 {dimension_numbers = #tpu.dot_dimension_numbers<[1], [0], [0], [1], [0, 0, 1, 1], [], []>} : vector<8x128xf32>, vector<128x128xf32>, vector<8x128xf32> -> vector<8x128xf32>
    %24 = vector.broadcast %20 : vector<1x128xf32> to vector<8x128xf32>
    %25 = arith.addf %24, %23 : vector<8x128xf32>
    %c0_21 = arith.constant 0 : index
    %c0_22 = arith.constant 0 : index
    %26 = vector.load %arg4[%c0_21, %c0_22] : memref<8x128xf32, #tpu.memory_space<vmem>>, vector<8x128xf32>
    tpu.vector_store %arg4[%c0_21, %c0_22], %25 {strides = array<i32>} : memref<8x128xf32, #tpu.memory_space<vmem>>, vector<8x128xf32>,
    return
  }
  func.func @transform_0(%arg0: i32) -> (i32, i32) {
    %c0_i32 = arith.constant 0 : i32
    %c0_i32_0 = arith.constant 0 : i32
    return %arg0, %c0_i32 : i32, i32
  }
  func.func @transform_1(%arg0: i32) -> (i32, i32, i32) {
    %c0_i32 = arith.constant 0 : i32
    %c0_i32_0 = arith.constant 0 : i32
    %c0_i32_1 = arith.constant 0 : i32
    %c0_i32_2 = arith.constant 0 : i32
    return %c0_i32, %c0_i32_0, %c0_i32_1 : i32, i32, i32
  }
  func.func @transform_2(%arg0: i32) -> (i32, i32, i32) {
    %c0_i32 = arith.constant 0 : i32
    %c0_i32_0 = arith.constant 0 : i32
    %c0_i32_1 = arith.constant 0 : i32
    %c0_i32_2 = arith.constant 0 : i32
    return %c0_i32, %c0_i32_0, %c0_i32_1 : i32, i32, i32
  }
  func.func @transform_3(%arg0: i32) -> (i32, i32) {
    %c0_i32 = arith.constant 0 : i32
    %c0_i32_0 = arith.constant 0 : i32
    return %arg0, %c0_i32 : i32, i32
  }
}

</mosaic_0001>

<bundles_post_ra>
// kernel: tpu_custom_call.1
= control target key start
LH: loop header
LB: loop body
LE: loop exit
PB: predicated region body
PF: predicated region fallthrough
CT: control target
= control target key end

     0   :  { %8 = vsyncpa [#allocation3], 0  ;;  %s680_s0 = inlined_call_operand.hbm [shape: f32[8,128], index: 0, kind: input, shape index: {}]   ;;  %s681_s1 = inlined_call_operand.hbm [shape: f32[3,128,128], index: 1, kind: input, shape index: {}]   ;;  %s682_s2 = inlined_call_operand.vmem [shape: f32[3,1,128], index: 2, kind: input, shape index: {}]   ;;  %s683_s3 = inlined_call_operand.hbm [shape: f32[8,128], index: 3, kind: output, shape index: {}]  }
   0x1   :  { %9 = vsyncpa [#allocation6], 0 }
   0x2   :  { %10 = vsyncpa [#allocation4], 0  ;;  %s581_s12 = smov [#allocation2]   ;;  %s582_s14 = smov [#allocation5]  }
   0x3   :  { %s17_s13 = sshll.u32 %s581_s12, 4  ;;  %s26_s15 = sshll.u32 %s582_s14, 4  ;;  %s18_s13 = int_to_ptr.vmem [resolvable:$true] %s17_s13  ;;  %s27_s15 = int_to_ptr.vmem [resolvable:$true] %s26_s15 }
   0x4   :  { %s523_s16 = scalar_lea.vmem %s18_s13, 128  ;;  %p528_p1 = scmp.lt.s32.totalorder %s18_s13, %s18_s13 }
   0x5   :  { %p524_p0 = scmp.ne.s32.totalorder %s18_s13, %s523_s16  ;;  %p529_p2 = scmp.lt.s32.totalorder %s523_s16, %s523_s16 }
   0x7   :  { %p530_p3 = por %p529_p2, %p528_p1 }
   0x9   :  { %p531_p4 = pnand %p530_p3, %p524_p0 }
   0xb   :  { %534 = shalt.err (!%p531_p4)
}
   0xc   :  { %20 = dma.hbm_to_vmem [thread:$0]  %s680_s0, 128, %s18_s13, [#allocation3]  }
   0xd   :  { %s543_s19 = scalar_lea.vmem %s27_s15, 6144  ;;  %p548_p6 = scmp.lt.s32.totalorder %s27_s15, %s27_s15 }
   0xe   :  { %p544_p5 = scmp.ne.s32.totalorder %s27_s15, %s543_s19  ;;  %p549_p7 = scmp.lt.s32.totalorder %s543_s19, %s543_s19 }
  0x10   :  { %p550_p8 = por %p549_p7, %p548_p6 }
  0x12   :  { %p551_p9 = pnand %p550_p8, %p544_p5 }
  0x14   :  { %554 = shalt.err (!%p551_p9)
}
  0x15   :  { %s583_s20 = smov 128   ;;  %s584_s21 = smov 8  }
  0x16   :  { %32 = dma.hbm_to_vmem [thread:$0]  %s681_s1, 6144, %s27_s15, [#allocation6], %s583_s20, %s583_s20, %s584_s21  }
  0x17   :  { %575 = dma.done.wait [#allocation3], 128  }
  0x18   :  { %576 = vsyncadd [#allocation3], 4294967168 }
  0x19   :  { %577 = dma.done.wait [#allocation6], 6144  }
  0x1a   :  { %578 = vsyncadd [#allocation6], 4294961152  ;;  %v585_v0 = vmov 0.0   ;;  %vm586_vm0 = vmmov 0   ;;  %v58_v1 = vld [vmem:[#allocation5 + $0x78] sm:$0xff]  ;;  %v57_v2 = vld [vmem:[#allocation5 + $0x70] sm:$0xff] }
  0x1b   :  { %403 = vmatprep.subr.mxu0 %v585_v0  ;;  %435 = vmatprep.mubr.msk.f32.mxu0 %vm586_vm0, %v585_v0  ;;  %v56_v3 = vld [vmem:[#allocation5 + $0x68] sm:$0xff]  ;;  %v55_v4 = vld [vmem:[#allocation5 + $0x60] sm:$0xff]  ;;  %v155_v5 = vld [vmem:[#allocation5 + $0xf8] sm:$0xff]  ;;  %s587_s28 = smov [#allocation7]  }
  0x1c   :  { %438 = vmatprep.subr.mxu1 %v585_v0  ;;  %470 = vmatprep.mubr.msk.f32.mxu1 %vm586_vm0, %v585_v0  ;;  %v54_v6 = vld [vmem:[#allocation5 + $0x58] sm:$0xff]  ;;  %v154_v7 = vld [vmem:[#allocation5 + $0xf0] sm:$0xff]  ;;  %v153_v8 = vld [vmem:[#allocation5 + $0xe8] sm:$0xff]  ;;  %s337_s29 = sshll.u32 %s587_s28, 4  ;;  %s338_s29 = int_to_ptr.vmem [resolvable:$true] %s337_s29 }
  0x1d   :  { %404 = vmatpush3.msra.mxu0 %v58_v1  ;;  %439 = vmatpush3.msra.mxu1 %v155_v5  ;;  %v53_v9 = vld [vmem:[#allocation5 + $0x50] sm:$0xff]  ;;  %v152_v10 = vld [vmem:[#allocation5 + $0xe0] sm:$0xff]  ;;  %v52_v11 = vld [vmem:[#allocation5 + $0x48] sm:$0xff]  ;;  %s555_s30 = scalar_lea.vmem %s338_s29, 128  ;;  %p560_p11 = scmp.lt.s32.totalorder %s338_s29, %s338_s29 }
  0x1e   :  { %405 = vmatprep.subr.mxu0 %v585_v0  ;;  %440 = vmatprep.subr.mxu1 %v585_v0  ;;  %v151_v12 = vld [vmem:[#allocation5 + $0xd8] sm:$0xff]  ;;  %v51_v13 = vld [vmem:[#allocation5 + $0x40] sm:$0xff]  ;;  %v150_v14 = vld [vmem:[#allocation5 + $0xd0] sm:$0xff]  ;;  %p556_p10 = scmp.ne.s32.totalorder %s338_s29, %s555_s30  ;;  %p561_p12 = scmp.lt.s32.totalorder %s555_s30, %s555_s30 }
  0x1f   :  { %406 = vmatpush3.msra.mxu0 %v57_v2  ;;  %441 = vmatpush3.msra.mxu1 %v154_v7  ;;  %v50_v15 = vld [vmem:[#allocation5 + $0x38] sm:$0xff]  ;;  %v149_v16 = vld [vmem:[#allocation5 + $0xc8] sm:$0xff]  ;;  %v49_v17 = vld [vmem:[#allocation5 + $0x30] sm:$0xff] }
  0x20   :  { %407 = vmatprep.subr.mxu0 %v585_v0  ;;  %442 = vmatprep.subr.mxu1 %v585_v0  ;;  %v148_v18 = vld [vmem:[#allocation5 + $0xc0] sm:$0xff]  ;;  %v48_v19 = vld [vmem:[#allocation5 + $0x28] sm:$0xff]  ;;  %v147_v20 = vld [vmem:[#allocation5 + $0xb8] sm:$0xff]  ;;  %p562_p13 = por %p561_p12, %p560_p11 }
  0x21   :  { %408 = vmatpush3.msra.mxu0 %v56_v3  ;;  %443 = vmatpush3.msra.mxu1 %v153_v8  ;;  %v47_v21 = vld [vmem:[#allocation5 + $0x20] sm:$0xff]  ;;  %v146_v22 = vld [vmem:[#allocation5 + $0xb0] sm:$0xff]  ;;  %v46_v23 = vld [vmem:[#allocation5 + $0x18] sm:$0xff] }
  0x22   :  { %409 = vmatprep.subr.mxu0 %v585_v0  ;;  %444 = vmatprep.subr.mxu1 %v585_v0  ;;  %v145_v24 = vld [vmem:[#allocation5 + $0xa8] sm:$0xff]  ;;  %v45_v25 = vld [vmem:[#allocation5 + $0x10] sm:$0xff]  ;;  %v144_v26 = vld [vmem:[#allocation5 + $0xa0] sm:$0xff]  ;;  %p563_p0 = pnand %p562_p13, %p556_p10 }
  0x23   :  { %410 = vmatpush3.msra.mxu0 %v55_v4  ;;  %445 = vmatpush3.msra.mxu1 %v152_v10  ;;  %v44_v27 = vld [vmem:[#allocation5 + $0x8] sm:$0xff]  ;;  %v143_v28 = vld [vmem:[#allocation5 + $0x98] sm:$0xff]  ;;  %v43_v29 = vld [vmem:[#allocation5] sm:$0xff] }
  0x24   :  { %411 = vmatprep.subr.mxu0 %v585_v0  ;;  %446 = vmatprep.subr.mxu1 %v585_v0  ;;  %v41_v30 = vld [vmem:[#allocation2] sm:$0xff]  ;;  %v142_v31 = vld [vmem:[#allocation5 + $0x90] sm:$0xff]  ;;  %v141_v32 = vld [vmem:[#allocation5 + $0x88] sm:$0xff] }
  0x25   :  { %412 = vmatpush3.msra.mxu0 %v54_v6  ;;  %447 = vmatpush3.msra.mxu1 %v151_v12  ;;  %v140_v33 = vld [vmem:[#allocation5 + $0x80] sm:$0xff]  ;;  %v252_v34 = vld [vmem:[#allocation5 + $0x178] sm:$0xff]  ;;  %v251_v35 = vld [vmem:[#allocation5 + $0x170] sm:$0xff] }
  0x26   :  { %413 = vmatprep.subr.mxu0 %v585_v0  ;;  %448 = vmatprep.subr.mxu1 %v585_v0  ;;  %v250_v36 = vld [vmem:[#allocation5 + $0x168] sm:$0xff]  ;;  %v249_v37 = vld [vmem:[#allocation5 + $0x160] sm:$0xff]  ;;  %v248_v38 = vld [vmem:[#allocation5 + $0x158] sm:$0xff] }
  0x27   :  { %414 = vmatpush3.msra.mxu0 %v53_v9  ;;  %449 = vmatpush3.msra.mxu1 %v150_v14  ;;  %v247_v39 = vld [vmem:[#allocation5 + $0x150] sm:$0xff]  ;;  %v246_v40 = vld [vmem:[#allocation5 + $0x148] sm:$0xff]  ;;  %v245_v41 = vld [vmem:[#allocation5 + $0x140] sm:$0xff] }
  0x28   :  { %415 = vmatprep.subr.mxu0 %v585_v0  ;;  %450 = vmatprep.subr.mxu1 %v585_v0  ;;  %v244_v42 = vld [vmem:[#allocation5 + $0x138] sm:$0xff]  ;;  %v243_v43 = vld [vmem:[#allocation5 + $0x130] sm:$0xff]  ;;  %v242_v44 = vld [vmem:[#allocation5 + $0x128] sm:$0xff] }
  0x29   :  { %416 = vmatpush3.msra.mxu0 %v52_v11  ;;  %451 = vmatpush3.msra.mxu1 %v149_v16  ;;  %v241_v45 = vld [vmem:[#allocation5 + $0x120] sm:$0xff]  ;;  %v240_v46 = vld [vmem:[#allocation5 + $0x118] sm:$0xff]  ;;  %v239_v52 = vld [vmem:[#allocation5 + $0x110] sm:$0xff] }
  0x2a   :  { %417 = vmatprep.subr.mxu0 %v585_v0  ;;  %452 = vmatprep.subr.mxu1 %v585_v0  ;;  %v347_v47 = vld [vmem:[%s682_s2] ss:$0 sm:$0xff]  ;;  %v238_v53 = vld [vmem:[#allocation5 + $0x108] sm:$0xff]  ;;  %v237_v54 = vld [vmem:[#allocation5 + $0x100] sm:$0xff] }
  0x2b   :  { %418 = vmatpush3.msra.mxu0 %v51_v13  ;;  %453 = vmatpush3.msra.mxu1 %v148_v18  ;;  %v349_v55 = vld [vmem:[%s682_s2 + $0x1] ss:$0 sm:$0xff]  ;;  %v351_v60 = vld [vmem:[%s682_s2 + $0x2] ss:$0 sm:$0xff] }
  0x2c   :  { %419 = vmatprep.subr.mxu0 %v585_v0  ;;  %454 = vmatprep.subr.mxu1 %v585_v0 }
  0x2d   :  { %420 = vmatpush3.msra.mxu0 %v50_v15  ;;  %455 = vmatpush3.msra.mxu1 %v147_v20 }
  0x2e   :  { %421 = vmatprep.subr.mxu0 %v585_v0  ;;  %456 = vmatprep.subr.mxu1 %v585_v0 }
  0x2f   :  { %422 = vmatpush3.msra.mxu0 %v49_v17  ;;  %457 = vmatpush3.msra.mxu1 %v146_v22 }
  0x30   :  { %423 = vmatprep.subr.mxu0 %v585_v0  ;;  %458 = vmatprep.subr.mxu1 %v585_v0 }
  0x31   :  { %424 = vmatpush3.msra.mxu0 %v48_v19  ;;  %459 = vmatpush3.msra.mxu1 %v145_v24 }
  0x32   :  { %425 = vmatprep.subr.mxu0 %v585_v0  ;;  %460 = vmatprep.subr.mxu1 %v585_v0 }
  0x33   :  { %426 = vmatpush3.msra.mxu0 %v47_v21  ;;  %461 = vmatpush3.msra.mxu1 %v144_v26 }
  0x34   :  { %427 = vmatprep.subr.mxu0 %v585_v0  ;;  %462 = vmatprep.subr.mxu1 %v585_v0 }
  0x35   :  { %428 = vmatpush3.msra.mxu0 %v46_v23  ;;  %463 = vmatpush3.msra.mxu1 %v143_v28 }
  0x36   :  { %429 = vmatprep.subr.mxu0 %v585_v0  ;;  %464 = vmatprep.subr.mxu1 %v585_v0 }
  0x37   :  { %430 = vmatpush3.msra.mxu0 %v45_v25  ;;  %465 = vmatpush3.msra.mxu1 %v142_v31 }
  0x38   :  { %431 = vmatprep.subr.mxu0 %v585_v0  ;;  %466 = vmatprep.subr.mxu1 %v585_v0 }
  0x39   :  { %432 = vmatpush3.msra.mxu0 %v44_v27  ;;  %467 = vmatpush3.msra.mxu1 %v141_v32 }
  0x3a   :  { %433 = vmatprep.subr.mxu0 %v585_v0  ;;  %468 = vmatprep.subr.mxu1 %v585_v0 }
  0x3b   :  { %434 = vmatpush3.msra.mxu0 %v43_v29  ;;  %469 = vmatpush3.msra.mxu1 %v140_v33 }
  0x3c   :  { %436 = vmatmul.mubr.f32.vlgmr.msra.gmra.mxu0 %v41_v30  ;;  %473 = vmatprep.subr.mxu0 %v585_v0 }
  0x3d   :  { %505 = vmatprep.mubr.msk.f32.mxu0 %vm586_vm0, %v585_v0  ;;  %474 = vmatpush3.msra.mxu0 %v252_v34 }
  0x3e   :  { %475 = vmatprep.subr.mxu0 %v585_v0 }
  0x3f   :  { %476 = vmatpush3.msra.mxu0 %v251_v35 }
  0x40   :  { %477 = vmatprep.subr.mxu0 %v585_v0 }
  0x41   :  { %478 = vmatpush3.msra.mxu0 %v250_v36 }
  0x42   :  { %479 = vmatprep.subr.mxu0 %v585_v0 }
  0x43   :  { %480 = vmatpush3.msra.mxu0 %v249_v37 }
  0x44   :  { %481 = vmatprep.subr.mxu0 %v585_v0 }
  0x45   :  { %482 = vmatpush3.msra.mxu0 %v248_v38 }
  0x46   :  { %483 = vmatprep.subr.mxu0 %v585_v0 }
  0x47   :  { %484 = vmatpush3.msra.mxu0 %v247_v39 }
  0x48   :  { %485 = vmatprep.subr.mxu0 %v585_v0 }
  0x49   :  { %486 = vmatpush3.msra.mxu0 %v246_v40 }
  0x4a   :  { %487 = vmatprep.subr.mxu0 %v585_v0 }
  0x4b   :  { %488 = vmatpush3.msra.mxu0 %v245_v41 }
  0x4c   :  { %489 = vmatprep.subr.mxu0 %v585_v0 }
  0x4d   :  { %490 = vmatpush3.msra.mxu0 %v244_v42 }
  0x4e   :  { %491 = vmatprep.subr.mxu0 %v585_v0 }
  0x4f   :  { %492 = vmatpush3.msra.mxu0 %v243_v43 }
  0x50   :  { %493 = vmatprep.subr.mxu0 %v585_v0 }
  0x51   :  { %494 = vmatpush3.msra.mxu0 %v242_v44 }
  0x52   :  { %495 = vmatprep.subr.mxu0 %v585_v0 }
  0x53   :  { %496 = vmatpush3.msra.mxu0 %v241_v45 }
  0x54   :  { %497 = vmatprep.subr.mxu0 %v585_v0 }
  0x55   :  { %498 = vmatpush3.msra.mxu0 %v240_v46 }
  0x56   :  { %499 = vmatprep.subr.mxu0 %v585_v0 }
  0x57   :  { %500 = vmatpush3.msra.mxu0 %v239_v52 }
  0x58   :  { %501 = vmatprep.subr.mxu0 %v585_v0 }
  0x59   :  { %502 = vmatpush3.msra.mxu0 %v238_v53 }
  0x5a   :  { %503 = vmatprep.subr.mxu0 %v585_v0 }
  0x5b   :  { %504 = vmatpush3.msra.mxu0 %v237_v54 }
  0xfc   :  { %v125_v48 = vpop.f32.mrf.mxu0 }
  0xfd   :  { %v135_v49 = vadd.f32 %v347_v47, %v125_v48 }
  0xfe   :  { %v437_v50 = vpop.f32.mrf.mxu0 }
  0xff   :  { %v136_v51 = vmax.f32 %v135_v49, 0.0 }
 0x101   :  { %471 = vmatmul.mubr.f32.vlgmr.msra.gmra.mxu1 %v136_v51 }
 0x1c1   :  { %v222_v56 = vpop.f32.mrf.mxu1 }
 0x1c2   :  { %v232_v57 = vadd.f32 %v349_v55, %v222_v56 }
 0x1c3   :  { %v472_v58 = vpop.f32.mrf.mxu1 }
 0x1c4   :  { %v233_v59 = vmax.f32 %v232_v57, 0.0 }
 0x1c6   :  { %506 = vmatmul.mubr.f32.vlgmr.msra.gmra.mxu0 %v233_v59 }
 0x286   :  { %v319_v61 = vpop.f32.mrf.mxu0 }
 0x287   :  { %v329_v62 = vadd.f32 %v351_v60, %v319_v61 }
 0x288   :  { %v507_v63 = vpop.f32.mrf.mxu0 }
 0x289   :  { %330 = vst [vmem:[#allocation7] sm:$0xff] %v329_v62 }
 0x28a   :  { %566 = shalt.err (!%p563_p0)
}
 0x28b   :  { %340 = dma.vmem_to_hbm [thread:$0]  %s338_s29, 128, %s683_s3, [#allocation4]  }
 0x28c   :  { %579 = dma.done.wait [#allocation4], 128  }
 0x28d   :  { %580 = vsyncadd [#allocation4], 4294967168 }
 0x28e   :  { %344 = vsyncpa [#allocation3], 1 }
 0x28f   :  { %345 = vsyncpa [#allocation6], 1 }
 0x290   :  { %346 = vsyncpa [#allocation4], 1 }

</bundles_post_ra>
